<compile_context>
chip_gen: v7x
topology: tpu7x:2x2x1
jax: 0.10.0
libtpu: 0.0.40
codegen_flags: <defaults>
</compile_context>

<pallas_src>
import math
import jax
import jax.numpy as jnp
from jax.experimental import pallas as pl
from jax.experimental.pallas import tpu as pltpu


# ---------------------------------------------------------------------------
# Main kernel: output in module layout (B, L, E), E on lanes.
# ---------------------------------------------------------------------------
def _graph_embedding_kernel(x_ref, w_ref, o_ref):
    # x_ref: (1, TILE_L, C)  activation tile (seq rows on sublanes, C on lanes)
    # w_ref: (C, E)          weight, resident across all grid steps
    # o_ref: (1, TILE_L, E)  output tile, E is the (lane-dense) minor dim
    x = x_ref[0]              # (TILE_L, C)
    w = w_ref[...]            # (C, E)

    # Accumulate in f32 (no-op casts when inputs are already f32).
    if x.dtype != jnp.float32:
        x = x.astype(jnp.float32)
    if w.dtype != jnp.float32:
        w = w.astype(jnp.float32)

    # K = C is tiny (2..4): unrolled VPU broadcast-FMA,
    #   out[l, e] = sum_c x[l, c] * w[c, e]
    # (TILE_L,1) lane-broadcast x (1,E) sublane-broadcast -> (TILE_L, E).
    num_c = x.shape[1]
    acc = x[:, 0:1] * w[0:1, :]
    for c in range(1, num_c):          # static unroll, C is tiny
        acc = acc + x[:, c:c + 1] * w[c:c + 1, :]

    o_ref[0] = acc.astype(o_ref.dtype)


def _round_up(x, m):
    return ((x + m - 1) // m) * m


def _pick_seq_tile(L, B, max_tile=4096):
    """Seq-tile (rows) for the (B, L, E)-output kernel.

    Returns either the full extent L (always a legal block) or a multiple of 8
    (ragged edge handled by Pallas masking).  Large tiles amortize the per-step
    overhead; when B == 1 the seq axis is split so the grid has >= 2 steps for
    v7x megacore sharding.
    """
    cap = max_tile
    if B < 2 and L > 8:
        cap = min(cap, _round_up(max(1, (L + 1) // 2), 8))
    if L <= cap:
        return L
    return cap


def graph_embedding_forward(inputs, embedding):
    """inputs: (B, input_size, seq_len); embedding: (input_size, E).
    Returns (B, seq_len, E), exactly like the PyTorch module."""
    B, C, L = inputs.shape
    C_w, E = embedding.shape
    assert C_w == C, "embedding rows must match inputs' channel dim"

    out_dtype = jnp.promote_types(inputs.dtype, embedding.dtype)

    # Layout fix-up on the SMALL tensor only (C = 2..4): (B, C, L) -> (B, L, C).
    x_t = jnp.transpose(inputs, (0, 2, 1))

    tile_l = _pick_seq_tile(L, B)
    grid = (B, pl.cdiv(L, tile_l))

    return pl.pallas_call(
        _graph_embedding_kernel,
        out_shape=jax.ShapeDtypeStruct((B, L, E), out_dtype),
        grid_spec=pltpu.PrefetchScalarGridSpec(
            num_scalar_prefetch=0,
            grid=grid,
            in_specs=[
                # activation: one batch element x one seq tile (rows on sublanes)
                pl.BlockSpec((1, tile_l, C), lambda b, s: (b, s, 0)),
                # tiny weight: same block every step -> stays resident in VMEM
                pl.BlockSpec((C, E), lambda b, s: (0, 0)),
            ],
            # output in the module layout; lane dim = E (128-dense for E=128)
            out_specs=pl.BlockSpec((1, tile_l, E), lambda b, s: (b, s, 0)),
        ),
        compiler_params=pltpu.CompilerParams(
            # both grid axes are independent -> shard across TensorCores (v7x)
            dimension_semantics=("parallel", "parallel"),
            # worst case (tile=4096, E=128) ~16-18 MB << 32 MiB; fits v5e/v6e/v7x
            vmem_limit_bytes=32 * 1024 * 1024,
        ),
    )(x_t, embedding)


# ---------------------------------------------------------------------------
# Lane-dense variant: output (B, E, L) with seq on lanes.  Use this when
# E < 128 and downstream consumers can take the transposed layout (do NOT
# follow it with jnp.transpose -- that is exactly the traffic we removed).
# ---------------------------------------------------------------------------
def _graph_embedding_lane_dense_kernel(x_ref, wt_ref, o_ref):
    # x_ref : (1, C, TILE_L)  native activation tile, lane dim = seq tile
    # wt_ref: (E, C)          embedding transposed (tiny, resident)
    # o_ref : (1, E, TILE_L)  lane-dense output tile
    x = x_ref[0]              # (C, TILE_L)
    wt = wt_ref[...]          # (E, C)
    if x.dtype != jnp.float32:
        x = x.astype(jnp.float32)
    if wt.dtype != jnp.float32:
        wt = wt.astype(jnp.float32)

    num_c = x.shape[0]
    acc = wt[:, 0:1] * x[0:1, :]
    for c in range(1, num_c):          # static unroll, C is tiny
        acc = acc + wt[:, c:c + 1] * x[c:c + 1, :]

    o_ref[0] = acc.astype(o_ref.dtype)


def _pick_lane_seq_tile(L, B, max_tile=4096):
    """Seq-tile (lanes) for the lane-dense kernel: full L, or a multiple of 128."""
    if L <= 128:
        return L
    n_chunks = -(-L // 128)
    cap = max_tile // 128
    if B < 2:
        cap = max(1, min(cap, (n_chunks + 1) // 2))   # keep >= 2 grid steps
    return min(n_chunks, cap) * 128


def graph_embedding_forward_lane_dense(inputs, embedding):
    """Returns (B, E, seq_len) -- the lane-dense layout (seq on lanes)."""
    B, C, L = inputs.shape
    C_w, E = embedding.shape
    assert C_w == C, "embedding rows must match inputs' channel dim"

    out_dtype = jnp.promote_types(inputs.dtype, embedding.dtype)
    wt = jnp.transpose(embedding)     # (E, C): tiny parameter, transposed once

    tile_l = _pick_lane_seq_tile(L, B)
    grid = (B, pl.cdiv(L, tile_l))

    return pl.pallas_call(
        _graph_embedding_lane_dense_kernel,
        out_shape=jax.ShapeDtypeStruct((B, E, L), out_dtype),
        grid_spec=pltpu.PrefetchScalarGridSpec(
            num_scalar_prefetch=0,
            grid=grid,
            in_specs=[
                pl.BlockSpec((1, C, tile_l), lambda b, s: (b, 0, s)),
                pl.BlockSpec((E, C), lambda b, s: (0, 0)),
            ],
            out_specs=pl.BlockSpec((1, E, tile_l), lambda b, s: (b, 0, s)),
        ),
        compiler_params=pltpu.CompilerParams(
            dimension_semantics=("parallel", "parallel"),
            vmem_limit_bytes=32 * 1024 * 1024,
        ),
    )(inputs, wt)


def init_graph_embedding_params(key, input_size, embedding_size):
    bound = 1.0 / math.sqrt(embedding_size)
    # uniform(-1/sqrt(E), 1/sqrt(E)) like the PyTorch init
    return jax.random.uniform(
        key, (input_size, embedding_size), dtype=jnp.float32,
        minval=-bound, maxval=bound,
    )


if __name__ == "__main__":
    key = jax.random.PRNGKey(0)
    k_w1, k_x1, k_w2, k_x2, k_w3, k_x3 = jax.random.split(key, 6)
    HI = jax.lax.Precision.HIGHEST

    # 1) Typical TSP shapes: 2-D coordinates, seq_len=50, embedding=128 (lane-dense E).
    B, C, L, E = 2, 2, 50, 128
    w = init_graph_embedding_params(k_w1, C, E)
    x = jax.random.normal(k_x1, (B, C, L), dtype=jnp.float32)
    out = jax.block_until_ready(graph_embedding_forward(x, w))
    ref = jnp.einsum("bcl,ce->ble", x, w, precision=HI)
    assert out.shape == (B, L, E)
    assert jnp.allclose(out, ref, atol=1e-5, rtol=1e-5)

    # 2) batch=1: exercises the >=2-grid-step split and the masked ragged seq edge.
    out1 = jax.block_until_ready(graph_embedding_forward(x[:1], w))
    assert out1.shape == (1, L, E)
    assert jnp.allclose(out1, ref[:1], atol=1e-5, rtol=1e-5)

    # 3) Small generic config from the module spec (channels=4, seq=8, hidden=32).
    B3, C3, L3, E3 = 2, 4, 8, 32
    w3 = init_graph_embedding_params(k_w2, C3, E3)
    x3 = jax.random.normal(k_x2, (B3, C3, L3), dtype=jnp.float32)
    out3 = jax.block_until_ready(graph_embedding_forward(x3, w3))
    assert out3.shape == (B3, L3, E3)
    assert jnp.allclose(out3, jnp.einsum("bcl,ce->ble", x3, w3, precision=HI),
                        atol=1e-5, rtol=1e-5)

    # 4) Lane-dense (B, E, L) variant for consumers that keep seq on lanes (E < 128).
    w4 = init_graph_embedding_params(k_w3, 4, 32)
    x4 = jax.random.normal(k_x3, (2, 4, 256), dtype=jnp.float32)
    out4 = jax.block_until_ready(graph_embedding_forward_lane_dense(x4, w4))
    assert out4.shape == (2, 32, 256)
    assert jnp.allclose(out4, jnp.einsum("bcl,ce->bel", x4, w4, precision=HI),
                        atol=1e-5, rtol=1e-5)

    print("KERNEL_OK")
</pallas_src>

<mosaic_0001>
module attributes {stable_mosaic.version = 11 : i64} {
  func.func @_graph_embedding_kernel(%arg0: i32, %arg1: i32, %arg2: memref<1x50x2xf32, #tpu.memory_space<vmem>>, %arg3: memref<2x128xf32, #tpu.memory_space<vmem>>, %arg4: memref<1x50x128xf32, #tpu.memory_space<vmem>>) attributes {dimension_semantics = [#tpu.dimension_semantics<parallel>, #tpu.dimension_semantics<parallel>], iteration_bounds = array<i64: 2, 1>, scalar_prefetch = 0 : i64, scratch_operands = 0 : i64, tpu.core_type = #tpu.core_type<tc>, window_params = [{transform_indices = @transform_0, window_bounds = array<i64: 1, 50, 2>}, {pipeline_mode = #tpu.pipeline_mode<synchronous>, transform_indices = @transform_1, window_bounds = array<i64: 2, 128>}, {transform_indices = @transform_2, window_bounds = array<i64: 1, 50, 128>}]} {
    %c0 = arith.constant 0 : index
    %c0_0 = arith.constant 0 : index
    %c0_1 = arith.constant 0 : index
    %0 = vector.load %arg2[%c0, %c0_0, %c0_1] : memref<1x50x2xf32, #tpu.memory_space<vmem>>, vector<1x50x2xf32>
    %1 = vector.shape_cast %0 : vector<1x50x2xf32> to vector<50x2xf32>
    %c0_2 = arith.constant 0 : index
    %c0_3 = arith.constant 0 : index
    %2 = vector.load %arg3[%c0_2, %c0_3] : memref<2x128xf32, #tpu.memory_space<vmem>>, vector<2x128xf32>
    %3 = vector.extract_strided_slice %1 {offsets = [0, 0], sizes = [50, 1], strides = [1, 1]} : vector<50x2xf32> to vector<50x1xf32>
    %4 = vector.extract_strided_slice %2 {offsets = [0, 0], sizes = [1, 128], strides = [1, 1]} : vector<2x128xf32> to vector<1x128xf32>
    %5 = vector.broadcast %3 : vector<50x1xf32> to vector<50x128xf32>
    %6 = vector.broadcast %4 : vector<1x128xf32> to vector<50x128xf32>
    %7 = arith.mulf %5, %6 : vector<50x128xf32>
    %8 = vector.extract_strided_slice %1 {offsets = [0, 1], sizes = [50, 1], strides = [1, 1]} : vector<50x2xf32> to vector<50x1xf32>
    %9 = vector.extract_strided_slice %2 {offsets = [1, 0], sizes = [1, 128], strides = [1, 1]} : vector<2x128xf32> to vector<1x128xf32>
    %10 = vector.broadcast %8 : vector<50x1xf32> to vector<50x128xf32>
    %11 = vector.broadcast %9 : vector<1x128xf32> to vector<50x128xf32>
    %12 = arith.mulf %10, %11 : vector<50x128xf32>
    %13 = arith.addf %7, %12 : vector<50x128xf32>
    %c0_4 = arith.constant 0 : index
    %c0_5 = arith.constant 0 : index
    %c0_6 = arith.constant 0 : index
    %14 = vector.load %arg4[%c0_4, %c0_5, %c0_6] : memref<1x50x128xf32, #tpu.memory_space<vmem>>, vector<1x50x128xf32>
    %15 = vector.shape_cast %14 : vector<1x50x128xf32> to vector<50x128xf32>
    %16 = vector.shape_cast %13 : vector<50x128xf32> to vector<1x50x128xf32>
    tpu.vector_store %arg4[%c0_4, %c0_5, %c0_6], %16 {strides = array<i32>} : memref<1x50x128xf32, #tpu.memory_space<vmem>>, vector<1x50x128xf32>,
    return
  }
  func.func @transform_0(%arg0: i32, %arg1: i32) -> (i32, i32, i32) {
    %c0_i32 = arith.constant 0 : i32
    %c0_i32_0 = arith.constant 0 : i32
    return %arg0, %arg1, %c0_i32 : i32, i32, i32
  }
  func.func @transform_1(%arg0: i32, %arg1: i32) -> (i32, i32) {
    %c0_i32 = arith.constant 0 : i32
    %c0_i32_0 = arith.constant 0 : i32
    %c0_i32_1 = arith.constant 0 : i32
    return %c0_i32, %c0_i32_0 : i32, i32
  }
  func.func @transform_2(%arg0: i32, %arg1: i32) -> (i32, i32, i32) {
    %c0_i32 = arith.constant 0 : i32
    %c0_i32_0 = arith.constant 0 : i32
    return %arg0, %arg1, %c0_i32 : i32, i32, i32
  }
}

</mosaic_0001>

<bundles_post_ra>
// kernel: tpu_custom_call.1
= control target key start
LH: loop header
LB: loop body
LE: loop exit
PB: predicated region body
PF: predicated region fallthrough
CT: control target
= control target key end

     0   :  { %s458_s9 = smov 0   ;;  %s460_s10 = smov 0   ;;  %s510_s0 = inlined_call_operand.vmem [shape: f32[2,50,2], index: 0, kind: input, shape index: {}]   ;;  %s511_s1 = inlined_call_operand.vmem [shape: f32[2,128], index: 1, kind: input, shape index: {}]   ;;  %s512_s2 = inlined_call_operand.vmem [shape: f32[2,50,128], index: 2, kind: output, shape index: {}]  }
   0x1   :  { %s462_s11 = smov 0  }
   0x2 LB: > { %s24_s12 = sadd.s32 1, %s435_s10  ;;  %p381_p0 = scmp.ge.s32.totalorder %s439_s11, 1  ;;  %s439_s11 = sphi %s462_s11, %s12_s11   ;;  %s435_s10 = sphi %s460_s10, %s514_s10   ;;  %s431_s9 = sphi %s458_s9, %s513_s9  }
   0x3   : > { %p26_p1 = scmp.ge.s32.totalorder %s24_s12, 2  ;;  %p133_p2 = scmp.lt.s32.totalorder %s439_s11, 3 }
   0x5   : > { %s516_s12 = smov (%p26_p1, %s24_s12), 0  ;;  %p134_p3 = pnand %p381_p0, %p133_p2 }
   0x6   : > { %p164_p4 = scmp.lt.s32.totalorder (!%p134_p3), %s431_s9, 1  ;;  %v441_v0 = vmov (!%p134_p3), 0   ;;  %v442_v8 = vmov (!%p134_p3), 1   ;;  %v226_v9 = vlaneseq (!%p134_p3)  ;;  %v190_v17 = vld [vmem:[%s511_s1] sm:$0x3] (!%p134_p3) }
   0x7   : > { %137 = sbr.rel (%p134_p3) target bundleno = 177 (0xb1), region = 28  ;;  %414 = vset.pattern.permute.xlu1 (!%p134_p3), %v441_v0  ;;  %413 = vset.pattern.permute.xlu0 (!%p134_p3), %v441_v0 }
   0x8   : > { %v227_v12 = vshrl.u32 (!%p134_p3), %v226_v9, 7 }
   0xa   : > { %v228_v15 = vsub.s32 (!%p134_p3), 0, %v227_v12  ;;  %v267_v16 = vsub.s32 (!%p134_p3), 1, %v227_v12 }
   0xc   : > { %v229_v20 = vrot.slane (!%p134_p3), %v190_v17, %v228_v15  ;;  %v268_v21 = vrot.slane (!%p134_p3), %v190_v17, %v267_v16 }
   0xe   : > { %s518_s9 = smov (!%p164_p4, %s431_s9), 1 }
   0xf   : > { %s386_s13 = smul.u32 56, %s518_s9 }
  0x11   : > { %s171_s16 = scalar_lea.vmem %s510_s0, %s386_s13  ;;  %s492_s21 = scalar_lea.vmem %s512_s2, %s386_s13 }
  0x12   : > { %v185_v1 = vld [vmem:[%s171_s16 + $0x10] sm:$0xff]  ;;  %v183_v2 = vld [vmem:[%s171_s16] sm:$0xff]  ;;  %v186_v3 = vld [vmem:[%s171_s16 + $0x18] sm:$0xff] }
  0x13   : > { %203 = vperm.xlu1 %414, %v185_v1   ;;  %193 = vperm.xlu0 %413, %v183_v2   ;;  %v184_v4 = vld [vmem:[%s171_s16 + $0x8] sm:$0xff]  ;;  %v187_v6 = vld [vmem:[%s171_s16 + $0x20] sm:$0xff]  ;;  %v189_v7 = vld [vmem:[%s171_s16 + $0x30] sm:$0x3] }
  0x14   : > { %v188_v5 = vld [vmem:[%s171_s16 + $0x28] sm:$0xff] }
  0x17   : > { %208 = vperm.xlu1 %414, %v186_v3   ;;  %198 = vperm.xlu0 %413, %v184_v4  }
  0x1b   : > { %218 = vperm.xlu1 %414, %v188_v5   ;;  %213 = vperm.xlu0 %413, %v187_v6  }
  0x1f   : > { %415 = vset.pattern.permute.xlu1 %v442_v8  ;;  %223 = vperm.xlu0 %413, %v189_v7  }
  0x20   : > { %238 = vperm.xlu1 %415, %v183_v2  }
  0x23   : > { %416 = vset.pattern.permute.xlu0 %v442_v8 }
  0x24   : > { %246 = vperm.xlu1 %415, %v185_v1   ;;  %242 = vperm.xlu0 %416, %v184_v4  }
  0x28   : > { %250 = vperm.xlu1 %415, %v186_v3   ;;  %254 = vperm.xlu0 %416, %v187_v6  }
  0x2c   : > { %258 = vperm.xlu1 %415, %v188_v5   ;;  %262 = vperm.xlu0 %416, %v189_v7  }
  0x92   : > { %v204_v10 = vpop.permute.xlu1 %203  ;;  %v194_v11 = vpop.permute.xlu0 %193 }
  0x93   : > { %v230_v24 = vmul.f32 %v229_v20, %v194_v11  ;;  %v232_v29 = vmul.f32 %v229_v20, %v204_v10 }
  0x96   : > { %v209_v13 = vpop.permute.xlu1 %208  ;;  %v199_v14 = vpop.permute.xlu0 %198 }
  0x97   : > { %v231_v30 = vmul.f32 %v229_v20, %v199_v14  ;;  %v233_v37 = vmul.f32 %v229_v20, %v209_v13 }
  0x9a   : > { %v219_v18 = vpop.permute.xlu1 %218  ;;  %v214_v19 = vpop.permute.xlu0 %213 }
  0x9b   : > { %v234_v38 = vmul.f32 %v229_v20, %v214_v19  ;;  %v235_v45 = vmul.f32 %v229_v20, %v219_v18 }
  0x9e   : > { %v224_v22 = vpop.permute.xlu0 %223 }
  0x9f   : > { %v239_v23 = vpop.permute.xlu1 %238  ;;  %v236_v46 = vmul.f32 %v229_v20, %v224_v22 }
  0xa0   : > { %v269_v25 = vmul.f32 %v268_v21, %v239_v23 }
  0xa2   : > { %v276_v26 = vadd.f32 %v269_v25, %v230_v24 }
  0xa3   : > { %v247_v27 = vpop.permute.xlu1 %246  ;;  %v243_v28 = vpop.permute.xlu0 %242 }
  0xa4   : > { %283 = vst [vmem:[%s492_s21] sm:$0xff] %v276_v26  ;;  %v271_v31 = vmul.f32 %v268_v21, %v247_v27  ;;  %v270_v32 = vmul.f32 %v268_v21, %v243_v28 }
  0xa6   : > { %v278_v33 = vadd.f32 %v271_v31, %v232_v29  ;;  %v277_v34 = vadd.f32 %v270_v32, %v231_v30 }
  0xa7   : > { %v251_v35 = vpop.permute.xlu1 %250  ;;  %v255_v36 = vpop.permute.xlu0 %254 }
  0xa8   : > { %285 = vst [vmem:[%s492_s21 + $0x10] sm:$0xff] %v278_v33  ;;  %284 = vst [vmem:[%s492_s21 + $0x8] sm:$0xff] %v277_v34  ;;  %v272_v39 = vmul.f32 %v268_v21, %v251_v35  ;;  %v273_v40 = vmul.f32 %v268_v21, %v255_v36 }
  0xaa   : > { %v279_v41 = vadd.f32 %v272_v39, %v233_v37  ;;  %v280_v42 = vadd.f32 %v273_v40, %v234_v38 }
  0xab   : > { %v259_v43 = vpop.permute.xlu1 %258  ;;  %v263_v44 = vpop.permute.xlu0 %262 }
  0xac   : > { %286 = vst [vmem:[%s492_s21 + $0x18] sm:$0xff] %v279_v41  ;;  %287 = vst [vmem:[%s492_s21 + $0x20] sm:$0xff] %v280_v42  ;;  %v274_v47 = vmul.f32 %v268_v21, %v259_v43  ;;  %v275_v48 = vmul.f32 %v268_v21, %v263_v44 }
  0xae   : > { %v281_v49 = vadd.f32 %v274_v47, %v235_v45  ;;  %v282_v50 = vadd.f32 %v275_v48, %v236_v46 }
  0xb0   : > { %288 = vst [vmem:[%s492_s21 + $0x28] sm:$0xff] %v281_v49  ;;  %289 = vst [vmem:[%s492_s21 + $0x30] sm:$0x3] %v282_v50 }
  0xb1 PF: > { %s12_s11 = sadd.s32 1, %s439_s11   ;;  %s513_s9 = smov %s435_s10 }
  0xb2   : > { %p9_p5 = scmp.ge.s32.totalorder %s12_s11, 4   ;;  %s514_s10 = smov %s516_s12 }
  0xb4   :  { %11 = sbr.rel (!%p9_p5) target bundleno = 2 (0x2), region = 58 }

</bundles_post_ra>
